<compile_context>
chip_gen: v7x
topology: tpu7x:2x2x1
jax: 0.10.0
libtpu: 0.0.40
codegen_flags: <defaults>
</compile_context>

<pallas_src>
import jax
import jax.numpy as jnp
from jax.experimental import pallas as pl
from jax.experimental.pallas import tpu as pltpu

NEG_SLOPE = 0.01   # nn.LeakyReLU() default
BN_EPS = 1e-5      # nn.BatchNorm3d default


# ---------------------------------------------------------------------------
# Pallas kernel: one deep MXU contraction per (batch, spatial-tile) grid step
# ---------------------------------------------------------------------------
def _conv_stats_kernel(xi_ref, w_ref, z_ref, s1_ref, s2_ref):
    """Polyphase ConvTranspose3d tile + partial BatchNorm statistics.

    xi_ref : (8*Cin, TN)   channels-major 2x2x2-neighbourhood im2col tile
    w_ref  : (8*Cout, 8*Cin) combined polyphase ConvTranspose3d weight
    z_ref  : (8*Cout, TN)  pre-bias conv output tile (lane-dense, TN % 128 == 0)
    s1_ref : (8*Cout, 1)   per-step partial sum        (BatchNorm stats)
    s2_ref : (8*Cout, 1)   per-step partial sum-of-sq  (BatchNorm stats)

    Stats are on the pre-bias output: the conv bias cancels in the following
    training-mode BatchNorm, padded lanes (xi == 0) contribute exactly 0, and
    the variance is computed around a bias-free (better-centred) value.
    """
    z = jnp.dot(w_ref[...], xi_ref[...], preferred_element_type=jnp.float32)
    z_ref[...] = z
    s1_ref[...] = jnp.sum(z, axis=1, keepdims=True)
    s2_ref[...] = jnp.sum(z * z, axis=1, keepdims=True)


# ---------------------------------------------------------------------------
# Glue helpers (pure layout / weight packing / static sizing)
# ---------------------------------------------------------------------------
def _round_up(n, m):
    return ((n + m - 1) // m) * m


def _vmem_limit_bytes():
    """64 MiB scoped VMEM on 128-MiB parts (v5e/v6e), 32 MiB otherwise (v7x)."""
    try:
        cap = pltpu.get_tpu_info().vmem_capacity_bytes
    except Exception:
        cap = 64 * 1024 * 1024
    return (64 if cap >= 128 * 1024 * 1024 else 32) * 1024 * 1024


def _pick_tile(npad, cg, c8, vmem_limit, force_multi_step):
    """Largest multiple-of-128 divisor of npad fitting the VMEM tile budget."""
    budget = vmem_limit // 2                      # headroom for pipeline extras
    per_lane = 2 * (cg + c8) * 4                  # dbl-buffered xi + z bytes/lane
    t_budget = (budget - cg * c8 * 4) // per_lane
    max_lanes = min(4096, max(128, (t_budget // 128) * 128))
    if force_multi_step and npad >= 256:          # >=2 grid steps for v7x 2xTC
        max_lanes = min(max_lanes, (npad // 256) * 128)
    best = 128
    t = 128
    while t <= min(npad, max_lanes):
        if npad % t == 0:
            best = t
        t += 128
    return best


def _im2col_nbr8(x, npad):
    """(B, Cin, D, H, W) -> (B, 8*Cin, npad) channels-major neighbour gather.

    Row index = (dd*4 + dh*2 + dw) * Cin + ci, neighbour offsets d in {0,1}.
    Only one zero plane of high-side padding per spatial dim is needed
    (output_padding=1 tail); no zero-stuffing of the input.  Spatial lanes are
    zero-padded to `npad` (a 128 multiple) -> padded lanes produce z == 0.
    """
    B, Cin, D, H, W = x.shape
    xp = jnp.pad(x, ((0, 0), (0, 0), (0, 1), (0, 1), (0, 1)))
    cols = []
    for dd in range(2):
        for dh in range(2):
            for dw in range(2):
                cols.append(xp[:, :, dd:dd + D, dh:dh + H, dw:dw + W])
    xi = jnp.stack(cols, axis=1).reshape(B, 8 * Cin, D * H * W)
    n = D * H * W
    if npad > n:
        xi = jnp.pad(xi, ((0, 0), (0, 0), (0, npad - n)))
    return xi


def _polyphase_weight(weight):
    """(Cin, Cout, 3, 3, 3) ConvTranspose3d weight -> (8*Cout, 8*Cin) matrix.

    With stride=2, pad=1: output o = 2*m + p reads input x[m + d] through
    kernel tap k = p + 1 - 2*d; valid (parity, neighbour, tap) triples per dim
    are {(0,0,1), (1,0,2), (1,1,0)}.
    Row index = cout * 8 + (pd*4 + ph*2 + pw); col index matches _im2col_nbr8.
    Built by pure indexing, so no extra rounding is introduced.
    """
    Cin, Cout = weight.shape[0], weight.shape[1]
    taps = ((0, 0, 1), (1, 0, 2), (1, 1, 0))
    w8 = jnp.zeros((Cout, 2, 2, 2, 2, 2, 2, Cin), jnp.float32)
    wf = weight.astype(jnp.float32)
    for pd, dd, kd in taps:
        for ph, dh, kh in taps:
            for pw, dw, kw in taps:
                w8 = w8.at[:, pd, ph, pw, dd, dh, dw, :].set(
                    jnp.transpose(wf[:, :, kd, kh, kw]))   # (Cout, Cin)
    return w8.reshape(8 * Cout, 8 * Cin)


# ---------------------------------------------------------------------------
# Public forward pass
# ---------------------------------------------------------------------------
@jax.jit
def conv_transpose_block(x, weight, bias, gamma, beta):
    """Forward pass of ConvTransposeBlock.

    x:      (B, Cin, D, H, W) float32   (PyTorch NCDHW)
    weight: (Cin, Cout, 3, 3, 3)        (PyTorch ConvTranspose3d layout)
    bias:   (Cout,)
    gamma, beta: (Cout,)  BatchNorm3d affine parameters
    Returns (B, Cout, 2D, 2H, 2W) float32.
    """
    B, Cin, D, H, W = x.shape
    Cout, K = weight.shape[1], weight.shape[2]
    if K != 3:
        # TODO(synk): polyphase path only derived for kernel_size=3 with the
        # module's fixed stride=2 / padding=1 / output_padding=1 config.
        raise NotImplementedError("conv_transpose_block: kernel_size must be 3")

    N = D * H * W              # one 2x2x2 output block per input voxel
    Cg = 8 * Cin               # im2col contraction depth
    C8 = 8 * Cout              # combined (channel, parity) output rows
    Npad = _round_up(N, 512 if N >= 512 else 128)   # lane-robust spatial extent
    vmem_limit = _vmem_limit_bytes()
    TN = _pick_tile(Npad, Cg, C8, vmem_limit, force_multi_step=(B == 1))
    nt = Npad // TN
    grid = (B, nt)

    xi = _im2col_nbr8(x.astype(jnp.float32), Npad)      # (B, Cg, Npad)
    w_t = _polyphase_weight(weight)                     # (C8, Cg)
    # TODO(synk): for very large channel counts (Cin, Cout >~ 128) the resident
    # (C8, Cg) weight should be K-tiled over a third "arbitrary" grid axis with
    # a VMEM f32 accumulator to fit v7x's 64 MiB VMEM; not needed at these sizes.

    cost = pl.CostEstimate(
        flops=2 * B * C8 * Cg * Npad,
        transcendentals=0,
        bytes_accessed=4 * (B * Cg * Npad + C8 * Cg + B * C8 * Npad
                            + 2 * B * nt * C8))

    # ---- pass 1 (only Pallas pass): conv + partial BatchNorm statistics ----
    z, s1p, s2p = pl.pallas_call(
        _conv_stats_kernel,
        out_shape=(jax.ShapeDtypeStruct((B, C8, Npad), jnp.float32),
                   jax.ShapeDtypeStruct((B, nt, C8, 1), jnp.float32),
                   jax.ShapeDtypeStruct((B, nt, C8, 1), jnp.float32)),
        grid_spec=pltpu.PrefetchScalarGridSpec(
            num_scalar_prefetch=0,
            grid=grid,
            in_specs=[
                pl.BlockSpec((None, Cg, TN), lambda b, t: (b, 0, t)),
                pl.BlockSpec((C8, Cg), lambda b, t: (0, 0)),
            ],
            out_specs=[
                pl.BlockSpec((None, C8, TN), lambda b, t: (b, 0, t)),
                pl.BlockSpec((None, None, C8, 1), lambda b, t: (b, t, 0, 0)),
                pl.BlockSpec((None, None, C8, 1), lambda b, t: (b, t, 0, 0)),
            ],
        ),
        compiler_params=pltpu.CompilerParams(
            dimension_semantics=("parallel", "parallel"),
            vmem_limit_bytes=vmem_limit),
        cost_estimate=cost,
    )(xi, w_t)

    # ---- glue: reduce stat partials, fold BN, fuse epilogue into transpose --
    n_el = B * (2 * D) * (2 * H) * (2 * W)
    s1 = s1p.sum(axis=(0, 1)).reshape(Cout, 8).sum(axis=1)     # per channel
    s2 = s2p.sum(axis=(0, 1)).reshape(Cout, 8).sum(axis=1)
    mean = s1 / n_el                       # pre-bias mean (bias-shifted below)
    var = s2 / n_el - mean * mean          # shift-invariant; computed bias-free
    scale = gamma.astype(jnp.float32) / jnp.sqrt(var + BN_EPS)
    shift = beta.astype(jnp.float32) - mean * scale
    # The conv bias cancels exactly: BN(z + b) with batch stats == BN(z).
    # TODO(synk): BatchNorm running_mean/running_var buffer updates (training
    # state mutation) are not modeled; they do not affect the forward output.
    del bias

    # Folded BN affine + LeakyReLU as plain jnp ops — XLA fuses them into the
    # parity de-interleave copy below (no extra read/write of z).
    v = (z[:, :, :N] * jnp.repeat(scale, 8).reshape(1, C8, 1)
         + jnp.repeat(shift, 8).reshape(1, C8, 1))
    o = jnp.where(v >= 0.0, v, NEG_SLOPE * v)
    o = o.reshape(B, Cout, 2, 2, 2, D, H, W)
    o = jnp.transpose(o, (0, 1, 5, 2, 6, 3, 7, 4))     # (B,Cout,D,2,H,2,W,2)
    return o.reshape(B, Cout, 2 * D, 2 * H, 2 * W)


# ---------------------------------------------------------------------------
# Pure-JAX reference (scatter formulation of ConvTranspose3d + BN + LeakyReLU)
# ---------------------------------------------------------------------------
def reference(x, weight, bias, gamma, beta):
    B, Cin, D, H, W = x.shape
    Cout, K = weight.shape[1], weight.shape[2]
    stride, pad, opad = 2, 1, 1
    Do = (D - 1) * stride - 2 * pad + K + opad
    Ho = (H - 1) * stride - 2 * pad + K + opad
    Wo = (W - 1) * stride - 2 * pad + K + opad
    Df, Hf, Wf = (D - 1) * stride + K, (H - 1) * stride + K, (W - 1) * stride + K
    yf = jnp.zeros((B, Cout, Df, Hf, Wf), jnp.float32)
    for kd in range(K):
        for kh in range(K):
            for kw in range(K):
                contrib = jnp.einsum('bidhw,io->bodhw', x,
                                     weight[:, :, kd, kh, kw],
                                     precision='highest')
                yf = yf.at[:, :,
                           kd:kd + (D - 1) * stride + 1:stride,
                           kh:kh + (H - 1) * stride + 1:stride,
                           kw:kw + (W - 1) * stride + 1:stride].add(contrib)
    y = yf[:, :, pad:pad + Do, pad:pad + Ho, pad:pad + Wo]
    y = y + bias[None, :, None, None, None]
    mean = y.mean(axis=(0, 2, 3, 4), keepdims=True)
    var = y.var(axis=(0, 2, 3, 4), keepdims=True)      # biased, as in PyTorch BN
    yn = (y - mean) / jnp.sqrt(var + BN_EPS)
    yn = yn * gamma[None, :, None, None, None] + beta[None, :, None, None, None]
    return jnp.where(yn >= 0.0, yn, NEG_SLOPE * yn)


if __name__ == "__main__":
    key = jax.random.PRNGKey(0)
    k1, k2, k3, k4, k5 = jax.random.split(key, 5)

    B, Cin, Cout, D, H, W, K = 2, 4, 8, 8, 8, 8, 3
    x = jax.random.normal(k1, (B, Cin, D, H, W), jnp.float32)
    weight = 0.1 * jax.random.normal(k2, (Cin, Cout, K, K, K), jnp.float32)
    bias = 0.1 * jax.random.normal(k3, (Cout,), jnp.float32)
    gamma = 1.0 + 0.1 * jax.random.normal(k4, (Cout,), jnp.float32)
    beta = 0.1 * jax.random.normal(k5, (Cout,), jnp.float32)

    out = conv_transpose_block(x, weight, bias, gamma, beta)
    out = jax.block_until_ready(out)
    assert out.shape == (B, Cout, 2 * D, 2 * H, 2 * W), out.shape

    ref = reference(x, weight, bias, gamma, beta)
    max_err = float(jnp.max(jnp.abs(out - ref)))
    assert jnp.allclose(out, ref, atol=3e-3, rtol=3e-3), max_err

    print("KERNEL_OK")
</pallas_src>

<mosaic_0001>
module attributes {stable_mosaic.version = 11 : i64} {
  func.func @_conv_stats_kernel(%arg0: i32, %arg1: i32, %arg2: memref<1x32x512xf32, #tpu.memory_space<vmem>>, %arg3: memref<64x32xf32, #tpu.memory_space<vmem>>, %arg4: memref<1x64x512xf32, #tpu.memory_space<vmem>>, %arg5: memref<1x1x64x1xf32, #tpu.memory_space<vmem>>, %arg6: memref<1x1x64x1xf32, #tpu.memory_space<vmem>>) attributes {dimension_semantics = [#tpu.dimension_semantics<parallel>, #tpu.dimension_semantics<parallel>], iteration_bounds = array<i64: 2, 1>, scalar_prefetch = 0 : i64, scratch_operands = 0 : i64, tpu.core_type = #tpu.core_type<tc>, window_params = [{transform_indices = @transform_0, window_bounds = array<i64: 1, 32, 512>}, {pipeline_mode = #tpu.pipeline_mode<synchronous>, transform_indices = @transform_1, window_bounds = array<i64: 64, 32>}, {transform_indices = @transform_2, window_bounds = array<i64: 1, 64, 512>}, {transform_indices = @transform_3, window_bounds = array<i64: 1, 1, 64, 1>}, {transform_indices = @transform_4, window_bounds = array<i64: 1, 1, 64, 1>}]} {
    %c0 = arith.constant 0 : index
    %c0_0 = arith.constant 0 : index
    %0 = vector.load %arg3[%c0, %c0_0] : memref<64x32xf32, #tpu.memory_space<vmem>>, vector<64x32xf32>
    %c0_1 = arith.constant 0 : index
    %c0_2 = arith.constant 0 : index
    %c0_3 = arith.constant 0 : index
    %1 = vector.load %arg2[%c0_1, %c0_2, %c0_3] : memref<1x32x512xf32, #tpu.memory_space<vmem>>, vector<1x32x512xf32>
    %2 = vector.shape_cast %1 : vector<1x32x512xf32> to vector<32x512xf32>
    %cst = arith.constant dense<0.000000e+00> : vector<64x512xf32>
    %3 = tpu.matmul %0, %2, %cst {dimension_numbers = #tpu.dot_dimension_numbers<[1], [0], [0], [1], [0, 0, 1, 1], [], []>} : vector<64x32xf32>, vector<32x512xf32>, vector<64x512xf32> -> vector<64x512xf32>
    %c0_4 = arith.constant 0 : index
    %c0_5 = arith.constant 0 : index
    %c0_6 = arith.constant 0 : index
    %4 = vector.load %arg4[%c0_4, %c0_5, %c0_6] : memref<1x64x512xf32, #tpu.memory_space<vmem>>, vector<1x64x512xf32>
    %5 = vector.shape_cast %4 : vector<1x64x512xf32> to vector<64x512xf32>
    %6 = vector.shape_cast %3 : vector<64x512xf32> to vector<1x64x512xf32>
    tpu.vector_store %arg4[%c0_4, %c0_5, %c0_6], %6 {strides = array<i32>} : memref<1x64x512xf32, #tpu.memory_space<vmem>>, vector<1x64x512xf32>,
    %cst_7 = arith.constant dense<0.000000e+00> : vector<64xf32>
    %7 = vector.multi_reduction <add>, %3, %cst_7 [1] : vector<64x512xf32> to vector<64xf32>
    %8 = vector.shape_cast %7 : vector<64xf32> to vector<64x1xf32>
    %c0_8 = arith.constant 0 : index
    %c0_9 = arith.constant 0 : index
    %c0_10 = arith.constant 0 : index
    %c0_11 = arith.constant 0 : index
    %9 = vector.load %arg5[%c0_8, %c0_9, %c0_10, %c0_11] : memref<1x1x64x1xf32, #tpu.memory_space<vmem>>, vector<1x1x64x1xf32>
    %10 = vector.shape_cast %9 : vector<1x1x64x1xf32> to vector<64x1xf32>
    %11 = vector.shape_cast %8 : vector<64x1xf32> to vector<1x1x64x1xf32>
    tpu.vector_store %arg5[%c0_8, %c0_9, %c0_10, %c0_11], %11 {strides = array<i32>} : memref<1x1x64x1xf32, #tpu.memory_space<vmem>>, vector<1x1x64x1xf32>,
    %12 = arith.mulf %3, %3 : vector<64x512xf32>
    %cst_12 = arith.constant dense<0.000000e+00> : vector<64xf32>
    %13 = vector.multi_reduction <add>, %12, %cst_12 [1] : vector<64x512xf32> to vector<64xf32>
    %14 = vector.shape_cast %13 : vector<64xf32> to vector<64x1xf32>
    %c0_13 = arith.constant 0 : index
    %c0_14 = arith.constant 0 : index
    %c0_15 = arith.constant 0 : index
    %c0_16 = arith.constant 0 : index
    %15 = vector.load %arg6[%c0_13, %c0_14, %c0_15, %c0_16] : memref<1x1x64x1xf32, #tpu.memory_space<vmem>>, vector<1x1x64x1xf32>
    %16 = vector.shape_cast %15 : vector<1x1x64x1xf32> to vector<64x1xf32>
    %17 = vector.shape_cast %14 : vector<64x1xf32> to vector<1x1x64x1xf32>
    tpu.vector_store %arg6[%c0_13, %c0_14, %c0_15, %c0_16], %17 {strides = array<i32>} : memref<1x1x64x1xf32, #tpu.memory_space<vmem>>, vector<1x1x64x1xf32>,
    return
  }
  func.func @transform_0(%arg0: i32, %arg1: i32) -> (i32, i32, i32) {
    %c0_i32 = arith.constant 0 : i32
    %c0_i32_0 = arith.constant 0 : i32
    return %arg0, %c0_i32, %arg1 : i32, i32, i32
  }
  func.func @transform_1(%arg0: i32, %arg1: i32) -> (i32, i32) {
    %c0_i32 = arith.constant 0 : i32
    %c0_i32_0 = arith.constant 0 : i32
    %c0_i32_1 = arith.constant 0 : i32
    return %c0_i32, %c0_i32_0 : i32, i32
  }
  func.func @transform_2(%arg0: i32, %arg1: i32) -> (i32, i32, i32) {
    %c0_i32 = arith.constant 0 : i32
    %c0_i32_0 = arith.constant 0 : i32
    return %arg0, %c0_i32, %arg1 : i32, i32, i32
  }
  func.func @transform_3(%arg0: i32, %arg1: i32) -> (i32, i32, i32, i32) {
    %c0_i32 = arith.constant 0 : i32
    %c0_i32_0 = arith.constant 0 : i32
    %c0_i32_1 = arith.constant 0 : i32
    return %arg0, %arg1, %c0_i32, %c0_i32_0 : i32, i32, i32, i32
  }
  func.func @transform_4(%arg0: i32, %arg1: i32) -> (i32, i32, i32, i32) {
    %c0_i32 = arith.constant 0 : i32
    %c0_i32_0 = arith.constant 0 : i32
    %c0_i32_1 = arith.constant 0 : i32
    return %arg0, %arg1, %c0_i32, %c0_i32_0 : i32, i32, i32, i32
  }
}

</mosaic_0001>

<bundles_post_ra>
// kernel: conv_transpose_block.1
= control target key start
LH: loop header
LB: loop body
LE: loop exit
PB: predicated region body
PF: predicated region fallthrough
CT: control target
= control target key end

     0   :  { %s1037_s15 = smov 0   ;;  %s1039_s16 = smov 0   ;;  %s1197_s0 = inlined_call_operand.vmem [shape: f32[2,32,512], index: 0, kind: input, shape index: {}]   ;;  %s1198_s1 = inlined_call_operand.vmem [shape: f32[64,32], index: 1, kind: input, shape index: {}]   ;;  %s1199_s2 = inlined_call_operand.vmem [shape: f32[2,64,512], index: 2, kind: output, shape index: {0}]   ;;  %s1200_s3 = inlined_call_operand.vmem [shape: f32[2,1,64,1], index: 3, kind: output, shape index: {1}]   ;;  %s1201_s4 = inlined_call_operand.vmem [shape: f32[2,1,64,1], index: 4, kind: output, shape index: {2}]  }
   0x1   :  { %s1041_s17 = smov 0  }
   0x2 LB: > { %s27_s18 = sadd.s32 1, %s1005_s16  ;;  %p915_p0 = scmp.ge.s32.totalorder %s1009_s17, 1  ;;  %s1009_s17 = sphi %s1041_s17, %s15_s17   ;;  %s1005_s16 = sphi %s1039_s16, %s1203_s16   ;;  %s1001_s15 = sphi %s1037_s15, %s1202_s15  }
   0x3   : > { %p29_p1 = scmp.ge.s32.totalorder %s27_s18, 2  ;;  %p192_p2 = scmp.lt.s32.totalorder %s1009_s17, 3 }
   0x5   : > { %s1205_s18 = smov (%p29_p1, %s27_s18), 0  ;;  %p193_p3 = pnand %p915_p0, %p192_p2 }
   0x6   : > { %p245_p4 = scmp.lt.s32.totalorder (!%p193_p3), %s1001_s15, 1  ;;  %v1011_v0 = vmov (!%p193_p3), 0.0   ;;  %v282_v25 = vld [vmem:[%s1198_s1] sm:$0xff] (!%p193_p3)  ;;  %vm306_vm0 = vcmask (!%p193_p3), 261120   ;;  %v283_v26 = vld [vmem:[%s1198_s1 + $0x8] sm:$0xff] (!%p193_p3)  ;;  %v284_v27 = vld [vmem:[%s1198_s1 + $0x10] sm:$0xff] (!%p193_p3) }
   0x7   : > { %196 = sbr.rel (%p193_p3) target bundleno = 425 (0x1a9), region = 28  ;;  %395 = vmatprep.mubr.f32.mxu0 (!%p193_p3), %v1011_v0  ;;  %508 = vmatprep.mubr.f32.mxu1 (!%p193_p3), %v1011_v0  ;;  %v285_v28 = vld [vmem:[%s1198_s1 + $0x18] sm:$0xff] (!%p193_p3)  ;;  %v286_v29 = vld [vmem:[%s1198_s1 + $0x20] sm:$0xff] (!%p193_p3)  ;;  %v287_v30 = vld [vmem:[%s1198_s1 + $0x28] sm:$0xff] (!%p193_p3)  ;;  %vm629_vm1 = vcmask (!%p193_p3), 7168  }
   0x8   : > { %v288_v31 = vld [vmem:[%s1198_s1 + $0x30] sm:$0xff] (!%p193_p3)  ;;  %v289_v32 = vld [vmem:[%s1198_s1 + $0x38] sm:$0xff] (!%p193_p3) }
   0xe   : > { %s1207_s15 = smov (!%p245_p4, %s1001_s15), 1 }
   0xf   : > { %s942_s19 = sshll.u32 %s1207_s15, 7  ;;  %s943_s13 = sshll.u32 %s1207_s15, 8 }
  0x10   : > { %s252_s22 = scalar_lea.vmem %s1197_s0, %s942_s19  ;;  %s1121_s20 = scalar_lea.vmem %s1199_s2, %s943_s13 }
  0x11   : > { %v291_v1 = vld [vmem:[%s252_s22 + $0x8] sm:$0xff]  ;;  %v290_v3 = vld [vmem:[%s252_s22] sm:$0xff]  ;;  %v293_v6 = vld [vmem:[%s252_s22 + $0x18] sm:$0xff]  ;;  %s944_s21 = sshll.u32 %s1207_s15, 6 }
  0x12   : > { %v295_v2 = vld [vmem:[%s252_s22 + $0x28] sm:$0xff]  ;;  %v294_v5 = vld [vmem:[%s252_s22 + $0x20] sm:$0xff]  ;;  %v297_v7 = vld [vmem:[%s252_s22 + $0x38] sm:$0xff]  ;;  %s1159_s24 = scalar_lea.vmem %s1200_s3, %s944_s21  ;;  %s281_s27 = scalar_lea.vmem %s1201_s4, %s944_s21 }
  0x13   : > { %v946_v4 = vpack.c.bf16 %v295_v2, %v291_v1  ;;  %v948_v8 = vpack.c.bf16 %v294_v5, %v290_v3  ;;  %v954_v9 = vpack.c.bf16 %v297_v7, %v293_v6  ;;  %v292_v10 = vld [vmem:[%s252_s22 + $0x10] sm:$0xff]  ;;  %v299_v12 = vld [vmem:[%s252_s22 + $0x48] sm:$0xff]  ;;  %v298_v15 = vld [vmem:[%s252_s22 + $0x40] sm:$0xff] }
  0x14   : > { %v296_v11 = vld [vmem:[%s252_s22 + $0x30] sm:$0xff]  ;;  %v303_v14 = vld [vmem:[%s252_s22 + $0x68] sm:$0xff]  ;;  %v302_v16 = vld [vmem:[%s252_s22 + $0x60] sm:$0xff] }
  0x15   : > { %947 = vmatprep.subr.bf16.mxu0 %v946_v4  ;;  %v956_v13 = vpack.c.bf16 %v296_v11, %v292_v10  ;;  %955 = vmatprep.subr.bf16.mxu1 %v954_v9  ;;  %v950_v17 = vpack.c.bf16 %v303_v14, %v299_v12  ;;  %v952_v18 = vpack.c.bf16 %v302_v16, %v298_v15  ;;  %v301_v19 = vld [vmem:[%s252_s22 + $0x58] sm:$0xff]  ;;  %v300_v21 = vld [vmem:[%s252_s22 + $0x50] sm:$0xff] }
  0x16   : > { %949 = vmatpush1.bf16.msra.mxu0 %v948_v8  ;;  %v305_v20 = vld [vmem:[%s252_s22 + $0x78] sm:$0xff]  ;;  %v304_v23 = vld [vmem:[%s252_s22 + $0x70] sm:$0xff] }
  0x17   : > { %957 = vmatpush1.bf16.msra.mxu1 %v956_v13  ;;  %v958_v22 = vpack.c.bf16 %v305_v20, %v301_v19  ;;  %951 = vmatprep.subr.bf16.mxu0 %v950_v17  ;;  %v960_v24 = vpack.c.bf16 %v304_v23, %v300_v21 }
  0x19   : > { %959 = vmatprep.subr.bf16.mxu1 %v958_v22 }
  0x1a   : > { %953 = vmatpush1.bf16.msra.mxu0 %v952_v18 }
  0x1b   : > { %961 = vmatpush1.bf16.msra.mxu1 %v960_v24 }
  0x1d   : > { %924 = vmatmul.mubr.msk.f32.vlgmr.msra.gmra.mrb[0].mxu0 %vm306_vm0, %v282_v25 }
  0x1e   : > { %932 = vmatmul.mubr.msk.f32.vlgmr.msra.gmra.mrb[0].mxu1 %vm306_vm0, %v282_v25  ;;  %401 = vmatprep.mubr.f32.mxu0 %v1011_v0 }
  0x1f   : > { %514 = vmatprep.mubr.f32.mxu1 %v1011_v0 }
  0x21   : > { %925 = vmatmul.mubr.msk.f32.gmra.mrb[2].mxu0 %vm306_vm0, %v283_v26 }
  0x22   : > { %933 = vmatmul.mubr.msk.f32.gmra.mrb[2].mxu1 %vm306_vm0, %v283_v26  ;;  %407 = vmatprep.mubr.f32.mxu0 %v1011_v0 }
  0x23   : > { %520 = vmatprep.mubr.f32.mxu1 %v1011_v0 }
  0x25   : > { %926 = vmatmul.mubr.msk.f32.gmra.mrb[4].mxu0 %vm306_vm0, %v284_v27 }
  0x26   : > { %413 = vmatprep.mubr.f32.mxu0 %v1011_v0  ;;  %934 = vmatmul.mubr.msk.f32.gmra.mrb[4].mxu1 %vm306_vm0, %v284_v27 }
  0x27   : > { %526 = vmatprep.mubr.f32.mxu1 %v1011_v0 }
  0x29   : > { %927 = vmatmul.mubr.msk.f32.gmra.mrb[6].mxu0 %vm306_vm0, %v285_v28 }
  0x2a   : > { %419 = vmatprep.mubr.f32.mxu0 %v1011_v0  ;;  %935 = vmatmul.mubr.msk.f32.gmra.mrb[6].mxu1 %vm306_vm0, %v285_v28 }
  0x2b   : > { %532 = vmatprep.mubr.f32.mxu1 %v1011_v0 }
  0x2d   : > { %928 = vmatmul.mubr.msk.f32.gmra.mrb[8].mxu0 %vm306_vm0, %v286_v29 }
  0x2e   : > { %425 = vmatprep.mubr.f32.mxu0 %v1011_v0  ;;  %936 = vmatmul.mubr.msk.f32.gmra.mrb[8].mxu1 %vm306_vm0, %v286_v29 }
  0x2f   : > { %538 = vmatprep.mubr.f32.mxu1 %v1011_v0 }
  0x31   : > { %929 = vmatmul.mubr.msk.f32.gmra.mrb[10].mxu0 %vm306_vm0, %v287_v30 }
  0x32   : > { %431 = vmatprep.mubr.f32.mxu0 %v1011_v0  ;;  %937 = vmatmul.mubr.msk.f32.gmra.mrb[10].mxu1 %vm306_vm0, %v287_v30 }
  0x33   : > { %544 = vmatprep.mubr.f32.mxu1 %v1011_v0 }
  0x35   : > { %930 = vmatmul.mubr.msk.f32.gmra.mrb[12].mxu0 %vm306_vm0, %v288_v31 }
  0x36   : > { %437 = vmatprep.mubr.f32.mxu0 %v1011_v0  ;;  %938 = vmatmul.mubr.msk.f32.gmra.mrb[12].mxu1 %vm306_vm0, %v288_v31 }
  0x37   : > { %550 = vmatprep.mubr.f32.mxu1 %v1011_v0 }
  0x39   : > { %931 = vmatmul.mubr.msk.f32.gmra.mrb[14].mxu0 %vm306_vm0, %v289_v32 }
  0x3a   : > { %939 = vmatmul.mubr.msk.f32.gmra.mrb[14].mxu1 %vm306_vm0, %v289_v32 }
  0xf0   : > { %v397_v33 = vpop.f32.mrb[0].mxu0 }
  0xf1   : > { %557 = vst [vmem:[%s1121_s20] sm:$0xff] %v397_v33  ;;  %v638_v34 = vmul.f32 %v397_v33, %v397_v33  ;;  %v399_v35 = vpop.f32.mrb[1].mxu0  ;;  %v510_v36 = vpop.f32.mrb[0].mxu1 }
  0xf2   : > { %558 = vst [vmem:[%s1121_s20 + $0x8] sm:$0xff] %v399_v35  ;;  %v589_v37 = vadd.f32 %v399_v35, %v397_v33  ;;  %v639_v38 = vmul.f32 %v399_v35, %v399_v35  ;;  %559 = vst [vmem:[%s1121_s20 + $0x10] sm:$0xff] %v510_v36  ;;  %v512_v39 = vpop.f32.mrb[1].mxu1  ;;  %v640_v40 = vmul.f32 %v510_v36, %v510_v36 }
  0xf3   : > { %560 = vst [vmem:[%s1121_s20 + $0x18] sm:$0xff] %v512_v39  ;;  %v641_v52 = vmul.f32 %v512_v39, %v512_v39 }
  0xf4   : > { %v403_v41 = vpop.f32.mrb[2].mxu0  ;;  %v590_v42 = vadd.f32 %v589_v37, %v510_v36  ;;  %v670_v43 = vadd.f32 %v639_v38, %v638_v34 }
  0xf5   : > { %561 = vst [vmem:[%s1121_s20 + $0x20] sm:$0xff] %v403_v41  ;;  %v642_v44 = vmul.f32 %v403_v41, %v403_v41  ;;  %v405_v45 = vpop.f32.mrb[3].mxu0  ;;  %v516_v46 = vpop.f32.mrb[2].mxu1 }
  0xf6   : > { %562 = vst [vmem:[%s1121_s20 + $0x28] sm:$0xff] %v405_v45  ;;  %v594_v47 = vadd.f32 %v405_v45, %v403_v41  ;;  %v643_v48 = vmul.f32 %v405_v45, %v405_v45  ;;  %563 = vst [vmem:[%s1121_s20 + $0x30] sm:$0xff] %v516_v46  ;;  %v644_v49 = vmul.f32 %v516_v46, %v516_v46  ;;  %v518_v50 = vpop.f32.mrb[3].mxu1 }
  0xf7   : > { %v591_v51 = vadd.f32 %v590_v42, %v512_v39  ;;  %564 = vst [vmem:[%s1121_s20 + $0x38] sm:$0xff] %v518_v50  ;;  %v671_v53 = vadd.f32 %v670_v43, %v640_v40  ;;  %v645_v0 = vmul.f32 %v518_v50, %v518_v50 }
  0xf8   : > { %v409_v54 = vpop.f32.mrb[4].mxu0  ;;  %v675_v55 = vadd.f32 %v643_v48, %v642_v44  ;;  %v595_v56 = vadd.f32 %v594_v47, %v516_v46 }
  0xf9   : > { %592 = vadd.xlane.f32.xlu0 %v591_v51  ;;  %565 = vst [vmem:[%s1121_s20 + $0x40] sm:$0xff] %v409_v54  ;;  %v646_v57 = vmul.f32 %v409_v54, %v409_v54  ;;  %v411_v58 = vpop.f32.mrb[5].mxu0  ;;  %v522_v59 = vpop.f32.mrb[4].mxu1  ;;  %v672_v60 = vadd.f32 %v671_v53, %v641_v52 }
  0xfa   : > { %566 = vst [vmem:[%s1121_s20 + $0x48] sm:$0xff] %v411_v58  ;;  %v599_v61 = vadd.f32 %v411_v58, %v409_v54  ;;  %v647_v62 = vmul.f32 %v411_v58, %v411_v58  ;;  %567 = vst [vmem:[%s1121_s20 + $0x50] sm:$0xff] %v522_v59  ;;  %v524_v63 = vpop.f32.mrb[5].mxu1  ;;  %v676_v1 = vadd.f32 %v675_v55, %v644_v49 }
  0xfb   : > { %v648_v2 = vmul.f32 %v522_v59, %v522_v59  ;;  %568 = vst [vmem:[%s1121_s20 + $0x58] sm:$0xff] %v524_v63  ;;  %v596_v3 = vadd.f32 %v595_v56, %v518_v50  ;;  %v649_v11 = vmul.f32 %v524_v63, %v524_v63 }
  0xfc   : > { %v415_v4 = vpop.f32.mrb[6].mxu0  ;;  %v677_v5 = vadd.f32 %v676_v1, %v645_v0  ;;  %v600_v6 = vadd.f32 %v599_v61, %v522_v59  ;;  %v680_v7 = vadd.f32 %v647_v62, %v646_v57 }
  0xfd   : > { %673 = vadd.xlane.f32.xlu0 %v672_v60  ;;  %569 = vst [vmem:[%s1121_s20 + $0x60] sm:$0xff] %v415_v4  ;;  %v650_v8 = vmul.f32 %v415_v4, %v415_v4  ;;  %v417_v9 = vpop.f32.mrb[7].mxu0  ;;  %v528_v10 = vpop.f32.mrb[6].mxu1 }
  0xfe   : > { %570 = vst [vmem:[%s1121_s20 + $0x68] sm:$0xff] %v417_v9  ;;  %v604_v12 = vadd.f32 %v417_v9, %v415_v4  ;;  %v651_v13 = vmul.f32 %v417_v9, %v417_v9  ;;  %678 = vadd.xlane.f32.xlu1 %v677_v5  ;;  %571 = vst [vmem:[%s1121_s20 + $0x70] sm:$0xff] %v528_v10  ;;  %v530_v14 = vpop.f32.mrb[7].mxu1  ;;  %v601_v15 = vadd.f32 %v600_v6, %v524_v63 }
  0xff   : > { %v652_v16 = vmul.f32 %v528_v10, %v528_v10  ;;  %572 = vst [vmem:[%s1121_s20 + $0x78] sm:$0xff] %v530_v14  ;;  %v681_v17 = vadd.f32 %v680_v7, %v648_v2  ;;  %v653_v25 = vmul.f32 %v530_v14, %v530_v14 }
 0x100   : > { %v421_v18 = vpop.f32.mrb[8].mxu0  ;;  %v605_v19 = vadd.f32 %v604_v12, %v528_v10  ;;  %v685_v20 = vadd.f32 %v651_v13, %v650_v8 }
 0x101   : > { %597 = vadd.xlane.f32.xlu0 %v596_v3  ;;  %573 = vst [vmem:[%s1121_s20 + $0x80] sm:$0xff] %v421_v18  ;;  %v654_v21 = vmul.f32 %v421_v18, %v421_v18  ;;  %v423_v22 = vpop.f32.mrb[9].mxu0  ;;  %v534_v23 = vpop.f32.mrb[8].mxu1  ;;  %v682_v24 = vadd.f32 %v681_v17, %v649_v11 }
 0x102   : > { %574 = vst [vmem:[%s1121_s20 + $0x88] sm:$0xff] %v423_v22  ;;  %v609_v26 = vadd.f32 %v423_v22, %v421_v18  ;;  %v655_v27 = vmul.f32 %v423_v22, %v423_v22  ;;  %602 = vadd.xlane.f32.xlu1 %v601_v15  ;;  %575 = vst [vmem:[%s1121_s20 + $0x90] sm:$0xff] %v534_v23  ;;  %v536_v28 = vpop.f32.mrb[9].mxu1  ;;  %v606_v29 = vadd.f32 %v605_v19, %v530_v14 }
 0x103   : > { %v656_v30 = vmul.f32 %v534_v23, %v534_v23  ;;  %576 = vst [vmem:[%s1121_s20 + $0x98] sm:$0xff] %v536_v28  ;;  %v686_v31 = vadd.f32 %v685_v20, %v652_v16  ;;  %v657_v39 = vmul.f32 %v536_v28, %v536_v28 }
 0x104   : > { %v427_v32 = vpop.f32.mrb[10].mxu0  ;;  %v610_v33 = vadd.f32 %v609_v26, %v534_v23  ;;  %v690_v34 = vadd.f32 %v655_v27, %v654_v21 }
 0x105   : > { %683 = vadd.xlane.f32.xlu0 %v682_v24  ;;  %577 = vst [vmem:[%s1121_s20 + $0xa0] sm:$0xff] %v427_v32  ;;  %v658_v35 = vmul.f32 %v427_v32, %v427_v32  ;;  %v429_v36 = vpop.f32.mrb[11].mxu0  ;;  %v540_v37 = vpop.f32.mrb[10].mxu1  ;;  %v687_v38 = vadd.f32 %v686_v31, %v653_v25 }
 0x106   : > { %578 = vst [vmem:[%s1121_s20 + $0xa8] sm:$0xff] %v429_v36  ;;  %v614_v40 = vadd.f32 %v429_v36, %v427_v32  ;;  %v659_v41 = vmul.f32 %v429_v36, %v429_v36  ;;  %607 = vadd.xlane.f32.xlu1 %v606_v29  ;;  %579 = vst [vmem:[%s1121_s20 + $0xb0] sm:$0xff] %v540_v37  ;;  %v611_v42 = vadd.f32 %v610_v33, %v536_v28  ;;  %v542_v43 = vpop.f32.mrb[11].mxu1 }
 0x107   : > { %v660_v44 = vmul.f32 %v540_v37, %v540_v37  ;;  %580 = vst [vmem:[%s1121_s20 + $0xb8] sm:$0xff] %v542_v43  ;;  %v691_v45 = vadd.f32 %v690_v34, %v656_v30  ;;  %v661_v53 = vmul.f32 %v542_v43, %v542_v43 }
 0x108   : > { %v433_v46 = vpop.f32.mrb[12].mxu0  ;;  %v615_v47 = vadd.f32 %v614_v40, %v540_v37  ;;  %v695_v48 = vadd.f32 %v659_v41, %v658_v35 }
 0x109   : > { %612 = vadd.xlane.f32.xlu0 %v611_v42  ;;  %581 = vst [vmem:[%s1121_s20 + $0xc0] sm:$0xff] %v433_v46  ;;  %v662_v49 = vmul.f32 %v433_v46, %v433_v46  ;;  %v435_v50 = vpop.f32.mrb[13].mxu0  ;;  %v546_v51 = vpop.f32.mrb[12].mxu1  ;;  %v692_v52 = vadd.f32 %v691_v45, %v657_v39 }
 0x10a   : > { %582 = vst [vmem:[%s1121_s20 + $0xc8] sm:$0xff] %v435_v50  ;;  %v619_v54 = vadd.f32 %v435_v50, %v433_v46  ;;  %v663_v55 = vmul.f32 %v435_v50, %v435_v50  ;;  %688 = vadd.xlane.f32.xlu1 %v687_v38  ;;  %583 = vst [vmem:[%s1121_s20 + $0xd0] sm:$0xff] %v546_v51  ;;  %v548_v56 = vpop.f32.mrb[13].mxu1  ;;  %v616_v57 = vadd.f32 %v615_v47, %v542_v43 }
 0x10b   : > { %v664_v58 = vmul.f32 %v546_v51, %v546_v51  ;;  %584 = vst [vmem:[%s1121_s20 + $0xd8] sm:$0xff] %v548_v56  ;;  %v696_v59 = vadd.f32 %v695_v48, %v660_v44  ;;  %v665_v3 = vmul.f32 %v548_v56, %v548_v56 }
 0x10c   : > { %v439_v60 = vpop.f32.mrb[14].mxu0  ;;  %v620_v61 = vadd.f32 %v619_v54, %v546_v51  ;;  %v700_v62 = vadd.f32 %v663_v55, %v662_v49 }
 0x10d   : > { %693 = vadd.xlane.f32.xlu0 %v692_v52  ;;  %585 = vst [vmem:[%s1121_s20 + $0xe0] sm:$0xff] %v439_v60  ;;  %v666_v63 = vmul.f32 %v439_v60, %v439_v60  ;;  %v441_v0 = vpop.f32.mrb[15].mxu0  ;;  %v552_v1 = vpop.f32.mrb[14].mxu1  ;;  %v697_v2 = vadd.f32 %v696_v59, %v661_v53 }
 0x10e   : > { %586 = vst [vmem:[%s1121_s20 + $0xe8] sm:$0xff] %v441_v0  ;;  %v624_v4 = vadd.f32 %v441_v0, %v439_v60  ;;  %v667_v5 = vmul.f32 %v441_v0, %v441_v0  ;;  %617 = vadd.xlane.f32.xlu1 %v616_v57  ;;  %587 = vst [vmem:[%s1121_s20 + $0xf0] sm:$0xff] %v552_v1  ;;  %v668_v6 = vmul.f32 %v552_v1, %v552_v1  ;;  %v554_v8 = vpop.f32.mrb[15].mxu1 }
 0x10f   : > { %v621_v7 = vadd.f32 %v620_v61, %v548_v56  ;;  %588 = vst [vmem:[%s1121_s20 + $0xf8] sm:$0xff] %v554_v8  ;;  %v701_v9 = vadd.f32 %v700_v62, %v664_v58  ;;  %v669_v11 = vmul.f32 %v554_v8, %v554_v8 }
 0x110   : > { %v705_v10 = vadd.f32 %v667_v5, %v666_v63  ;;  %v625_v12 = vadd.f32 %v624_v4, %v552_v1 }
 0x111   : > { %622 = vadd.xlane.f32.xlu0 %v621_v7  ;;  %v702_v13 = vadd.f32 %v701_v9, %v665_v3 }
 0x112   : > { %698 = vadd.xlane.f32.xlu1 %v697_v2  ;;  %v626_v14 = vadd.f32 %v625_v12, %v554_v8  ;;  %v706_v15 = vadd.f32 %v705_v10, %v668_v6 }
 0x114   : > { %v707_v16 = vadd.f32 %v706_v15, %v669_v11 }
 0x115   : > { %703 = vadd.xlane.f32.xlu0 %v702_v13 }
 0x116   : > { %627 = vadd.xlane.f32.xlu1 %v626_v14 }
 0x11a   : > { %708 = vadd.xlane.f32.xlu1 %v707_v16 }
 0x186   : > { %v593_v17 = vpop.xlane.xlu0 %592 }
 0x187   : > { %630 = vst.msk [vmem:[%s1159_s24] sm:$0xff] %vm629_vm1, %v593_v17 }
 0x18a   : > { %v674_v18 = vpop.xlane.xlu0 %673 }
 0x18b   : > { %710 = vst.msk [vmem:[%s281_s27] sm:$0xff] %vm629_vm1, %v674_v18  ;;  %v679_v19 = vpop.xlane.xlu1 %678 }
 0x18c   : > { %711 = vst.msk [vmem:[%s281_s27 + $0x8] sm:$0xff] %vm629_vm1, %v679_v19 }
 0x18e   : > { %v598_v20 = vpop.xlane.xlu0 %597 }
 0x18f   : > { %631 = vst.msk [vmem:[%s1159_s24 + $0x8] sm:$0xff] %vm629_vm1, %v598_v20  ;;  %v603_v21 = vpop.xlane.xlu1 %602 }
 0x190   : > { %632 = vst.msk [vmem:[%s1159_s24 + $0x10] sm:$0xff] %vm629_vm1, %v603_v21 }
 0x192   : > { %v684_v22 = vpop.xlane.xlu0 %683 }
 0x193   : > { %712 = vst.msk [vmem:[%s281_s27 + $0x10] sm:$0xff] %vm629_vm1, %v684_v22  ;;  %v608_v23 = vpop.xlane.xlu1 %607 }
 0x194   : > { %633 = vst.msk [vmem:[%s1159_s24 + $0x18] sm:$0xff] %vm629_vm1, %v608_v23 }
 0x196   : > { %v613_v24 = vpop.xlane.xlu0 %612 }
 0x197   : > { %634 = vst.msk [vmem:[%s1159_s24 + $0x20] sm:$0xff] %vm629_vm1, %v613_v24  ;;  %v689_v25 = vpop.xlane.xlu1 %688 }
 0x198   : > { %713 = vst.msk [vmem:[%s281_s27 + $0x18] sm:$0xff] %vm629_vm1, %v689_v25 }
 0x19a   : > { %v694_v26 = vpop.xlane.xlu0 %693 }
 0x19b   : > { %714 = vst.msk [vmem:[%s281_s27 + $0x20] sm:$0xff] %vm629_vm1, %v694_v26  ;;  %v618_v27 = vpop.xlane.xlu1 %617 }
 0x19c   : > { %635 = vst.msk [vmem:[%s1159_s24 + $0x28] sm:$0xff] %vm629_vm1, %v618_v27 }
 0x19e   : > { %v623_v28 = vpop.xlane.xlu0 %622 }
 0x19f   : > { %636 = vst.msk [vmem:[%s1159_s24 + $0x30] sm:$0xff] %vm629_vm1, %v623_v28  ;;  %v699_v29 = vpop.xlane.xlu1 %698 }
 0x1a0   : > { %715 = vst.msk [vmem:[%s281_s27 + $0x28] sm:$0xff] %vm629_vm1, %v699_v29 }
 0x1a2   : > { %v704_v30 = vpop.xlane.xlu0 %703 }
 0x1a3   : > { %716 = vst.msk [vmem:[%s281_s27 + $0x30] sm:$0xff] %vm629_vm1, %v704_v30  ;;  %v628_v31 = vpop.xlane.xlu1 %627 }
 0x1a4   : > { %637 = vst.msk [vmem:[%s1159_s24 + $0x38] sm:$0xff] %vm629_vm1, %v628_v31 }
 0x1a7   : > { %v709_v32 = vpop.xlane.xlu1 %708 }
 0x1a8   : > { %717 = vst.msk [vmem:[%s281_s27 + $0x38] sm:$0xff] %vm629_vm1, %v709_v32 }
 0x1a9 PF: > { %s15_s17 = sadd.s32 1, %s1009_s17   ;;  %s1202_s15 = smov %s1005_s16 }
 0x1aa   : > { %p12_p5 = scmp.ge.s32.totalorder %s15_s17, 4   ;;  %s1203_s16 = smov %s1205_s18 }
 0x1ac   :  { %14 = sbr.rel (!%p12_p5) target bundleno = 2 (0x2), region = 82 }

</bundles_post_ra>
